<compile_context>
chip_gen: v6e
topology: v6e:2x2x1
jax: 0.10.0
libtpu: 0.0.40
codegen_flags: <defaults>
</compile_context>

<pallas_src>
import jax
import jax.numpy as jnp
import numpy as np
from jax.experimental import pallas as pl
from jax.experimental.pallas import tpu as pltpu

HID = 64    # conv1 output channels (fixed by the module)
LANE = 128


def attention_kernel(x_ref, w1t_ref, b1_ref, w2t_ref, b2_ref, out_ref, mask_ref):
    # x_ref: (C, TL) bf16 tile — channels on sublanes, pixels on lanes (lane-dense).
    # Upcast once; all math stays f32 in-register (v5e has no bf16 VPU).
    x = x_ref[...].astype(jnp.float32)
    # conv1 (1x1) + folded BN1 + ReLU:  (HID, C) @ (C, TL) -> (HID, TL)
    h = jnp.dot(w1t_ref[...], x, preferred_element_type=jnp.float32) + b1_ref[...]
    h = jnp.maximum(h, 0.0)
    # conv2 (1x1) + folded BN2:  (1, HID) @ (HID, TL) -> (1, TL)  (lane-wide output)
    # TODO(synk): if compute ever shows over DMA, replace this M=1 matmul with a
    # VPU multiply + sublane reduction to free the MXU slot.
    m = jnp.dot(w2t_ref[...], h, preferred_element_type=jnp.float32) + b2_ref[0]
    mask = jax.nn.sigmoid(m)                          # (1, TL) f32
    mask_ref[...] = mask.astype(mask_ref.dtype)       # lane-dense bf16 store
    out_ref[...] = ((mask + 1.0) * x).astype(out_ref.dtype)   # (C, TL) bf16 store


def _round_up(x, m):
    return ((x + m - 1) // m) * m


def _vmem_budgets():
    """Per-generation tile budget + vmem limit derived from the chip's VMEM."""
    cap = 64 << 20  # conservative fallback (v7x per-TC VMEM)
    try:
        info = pltpu.get_tpu_info()
        cap = int(getattr(info, "vmem_capacity_bytes", cap)) or cap
    except Exception:
        pass
    budget = min(48 << 20, cap // 3)                  # ~43 MiB on 128 MiB chips, ~21 MiB on v7x
    limit = min(96 << 20, max(32 << 20, int(cap * 0.7)))
    return budget, limit


def _pick_tile(hw, c, batch, budget_bytes):
    """Tile size TL along H*W (multiple of 128) and padded pixel count.

    Keeps double-buffered bf16 x+out+mask tiles (plus resident f32 weights)
    inside `budget_bytes`, pads H*W to a multiple of TL so every block is full
    and lane-dense, and guarantees >= 2 total grid steps so both v7x TCs work.
    """
    resident = (HID * c + 2 * HID) * 4                # W1ᵀ + b1 + W2ᵀ, f32
    avail = max(budget_bytes - resident, 1 << 20)
    bytes_per_lane = 2 * (2 * c + 1) * 2              # double-buffered bf16 x + out + mask
    max_tl = max(LANE, (avail // bytes_per_lane) // LANE * LANE)

    hw_lanes = _round_up(hw, LANE)
    tl = min(hw_lanes, max_tl)
    # Ensure at least 2 grid steps overall (v7x has 2 TensorCores).
    if batch * ((hw_lanes + tl - 1) // tl) < 2 and hw_lanes > LANE:
        tl = max(LANE, (hw_lanes // 2) // LANE * LANE)
    hw_pad = _round_up(hw_lanes, tl)
    return tl, hw_pad


def attention_forward(x_nchw, w1t, b1, w2t, b2):
    b, c, h, w = x_nchw.shape
    hw = h * w
    budget, vmem_limit = _vmem_budgets()
    tl, hw_pad = _pick_tile(hw, c, b, budget)

    # Free reshape (keeps NCHW order); bf16 HBM copy halves DMA bytes.
    x3 = x_nchw.reshape(b, c, hw).astype(jnp.bfloat16)
    if hw_pad != hw:
        x3 = jnp.pad(x3, ((0, 0), (0, 0), (0, hw_pad - hw)))

    grid = (b, hw_pad // tl)

    out3, mask3 = pl.pallas_call(
        attention_kernel,
        out_shape=(
            jax.ShapeDtypeStruct((b, c, hw_pad), jnp.bfloat16),
            jax.ShapeDtypeStruct((b, 1, hw_pad), jnp.bfloat16),
        ),
        grid=grid,
        in_specs=[
            pl.BlockSpec((None, c, tl), lambda i, j: (i, 0, j)),   # x tile (batch squeezed)
            pl.BlockSpec((HID, c), lambda i, j: (0, 0)),           # W1ᵀ (full, resident, f32)
            pl.BlockSpec((HID, 1), lambda i, j: (0, 0)),           # b1 column (f32)
            pl.BlockSpec((1, HID), lambda i, j: (0, 0)),           # W2ᵀ (full, resident, f32)
            pl.BlockSpec(memory_space=pltpu.MemorySpace.SMEM),     # b2 scalar in SMEM
        ],
        out_specs=(
            pl.BlockSpec((None, c, tl), lambda i, j: (i, 0, j)),   # mask_map tile (bf16)
            pl.BlockSpec((None, 1, tl), lambda i, j: (i, 0, j)),   # mask tile (bf16, lane-dense)
        ),
        compiler_params=pltpu.CompilerParams(
            dimension_semantics=("parallel", "parallel"),
            vmem_limit_bytes=vmem_limit,
        ),
    )(x3, w1t, b1, w2t, b2)

    mask_map = out3[:, :, :hw].reshape(b, c, h, w)
    mask = mask3[:, :, :hw].reshape(b, 1, h, w)
    return mask_map, mask


def make_params(key, in_dim):
    """Deterministic synthetic parameters; BN folded into conv weight/bias.

    Returns weights already in the kernel's orientation:
      w1t: (HID, C)   b1: (HID, 1)   w2t: (1, HID)   b2: (1,)
    """
    ks = jax.random.split(key, 8)
    eps = 1e-5

    # conv1: xavier-uniform weight (C -> 64), zero bias
    bound1 = float(np.sqrt(6.0 / (in_dim + HID)))
    w1t = jax.random.uniform(ks[0], (HID, in_dim), jnp.float32, -bound1, bound1)
    b1 = jnp.zeros((HID,), jnp.float32)
    # BN1 running stats / affine (synthetic but non-trivial)
    gamma1 = 1.0 + 0.1 * jax.random.normal(ks[1], (HID,), jnp.float32)
    beta1 = 0.1 * jax.random.normal(ks[2], (HID,), jnp.float32)
    mean1 = 0.1 * jax.random.normal(ks[3], (HID,), jnp.float32)
    var1 = jnp.abs(1.0 + 0.1 * jax.random.normal(ks[4], (HID,), jnp.float32))
    s1 = gamma1 / jnp.sqrt(var1 + eps)
    w1t_e = w1t * s1[:, None]                               # (HID, C)
    b1_e = ((b1 - mean1) * s1 + beta1)[:, None]             # (HID, 1)

    # conv2: xavier-uniform weight (64 -> 1), zero bias
    bound2 = float(np.sqrt(6.0 / (HID + 1)))
    w2t = jax.random.uniform(ks[5], (1, HID), jnp.float32, -bound2, bound2)
    b2 = jnp.zeros((1,), jnp.float32)
    gamma2 = jnp.array([1.05], jnp.float32)
    beta2 = jnp.array([0.02], jnp.float32)
    mean2 = jnp.array([0.03], jnp.float32)
    var2 = jnp.array([0.9], jnp.float32)
    s2 = gamma2 / jnp.sqrt(var2 + eps)
    w2t_e = w2t * s2[:, None]                               # (1, HID)
    b2_e = (b2 - mean2) * s2 + beta2                        # (1,)

    return w1t_e, b1_e, w2t_e, b2_e


def reference_forward(x_nchw, w1t, b1, w2t, b2):
    """Pure-JAX reference (same folded-BN math, same bf16-truncated input)."""
    b, c, h, w = x_nchw.shape
    x3 = x_nchw.reshape(b, c, h * w).astype(jnp.bfloat16).astype(jnp.float32)
    hh = jnp.maximum(jnp.einsum('oc,bcl->bol', w1t, x3) + b1[None], 0.0)
    m = jax.nn.sigmoid(jnp.einsum('oh,bhl->bol', w2t, hh) + b2[0])
    out = (m + 1.0) * x3
    return out.reshape(b, c, h, w), m.reshape(b, 1, h, w)


if __name__ == "__main__":
    key = jax.random.PRNGKey(0)
    k_x, k_p = jax.random.split(key)

    B, C, H, W = 2, 4, 16, 16
    x = jax.random.normal(k_x, (B, C, H, W), jnp.float32)

    w1t, b1, w2t, b2 = make_params(k_p, C)

    mask_map, mask = attention_forward(x, w1t, b1, w2t, b2)
    jax.block_until_ready((mask_map, mask))

    ref_map, ref_mask = reference_forward(x, w1t, b1, w2t, b2)
    # bf16 HBM I/O -> compare with bf16-appropriate tolerances.
    np.testing.assert_allclose(np.asarray(mask_map, dtype=np.float32),
                               np.asarray(ref_map, dtype=np.float32),
                               rtol=2e-2, atol=2e-2)
    np.testing.assert_allclose(np.asarray(mask, dtype=np.float32),
                               np.asarray(ref_mask, dtype=np.float32),
                               rtol=2e-2, atol=2e-2)
    assert mask_map.shape == (B, C, H, W) and mask.shape == (B, 1, H, W)

    print("KERNEL_OK")
</pallas_src>

<mosaic_0001>
module attributes {stable_mosaic.version = 11 : i64} {
  func.func @attention_kernel(%arg0: i32, %arg1: i32, %arg2: memref<1x4x256xbf16, #tpu.memory_space<vmem>>, %arg3: memref<64x4xf32, #tpu.memory_space<vmem>>, %arg4: memref<64x1xf32, #tpu.memory_space<vmem>>, %arg5: memref<1x64xf32, #tpu.memory_space<vmem>>, %arg6: memref<1xf32, #tpu.memory_space<smem>>, %arg7: memref<1x4x256xbf16, #tpu.memory_space<vmem>>, %arg8: memref<1x1x256xbf16, #tpu.memory_space<vmem>>) attributes {dimension_semantics = [#tpu.dimension_semantics<parallel>, #tpu.dimension_semantics<parallel>], iteration_bounds = array<i64: 2, 1>, scalar_prefetch = 0 : i64, scratch_operands = 0 : i64, tpu.core_type = #tpu.core_type<tc>, window_params = [{transform_indices = @transform_0, window_bounds = array<i64: 1, 4, 256>}, {pipeline_mode = #tpu.pipeline_mode<synchronous>, transform_indices = @transform_1, window_bounds = array<i64: 64, 4>}, {pipeline_mode = #tpu.pipeline_mode<synchronous>, transform_indices = @transform_2, window_bounds = array<i64: 64, 1>}, {pipeline_mode = #tpu.pipeline_mode<synchronous>, transform_indices = @transform_3, window_bounds = array<i64: 1, 64>}, {transform_indices = @transform_4, window_bounds = array<i64: 1>}, {transform_indices = @transform_5, window_bounds = array<i64: 1, 4, 256>}, {transform_indices = @transform_6, window_bounds = array<i64: 1, 1, 256>}]} {
    %c0 = arith.constant 0 : index
    %c0_0 = arith.constant 0 : index
    %c0_1 = arith.constant 0 : index
    %0 = vector.load %arg2[%c0, %c0_0, %c0_1] : memref<1x4x256xbf16, #tpu.memory_space<vmem>>, vector<1x4x256xbf16>
    %1 = vector.shape_cast %0 : vector<1x4x256xbf16> to vector<4x256xbf16>
    %2 = arith.extf %1 : vector<4x256xbf16> to vector<4x256xf32>
    %c0_2 = arith.constant 0 : index
    %c0_3 = arith.constant 0 : index
    %3 = vector.load %arg3[%c0_2, %c0_3] : memref<64x4xf32, #tpu.memory_space<vmem>>, vector<64x4xf32>
    %cst = arith.constant dense<0.000000e+00> : vector<64x256xf32>
    %4 = tpu.matmul %3, %2, %cst {dimension_numbers = #tpu.dot_dimension_numbers<[1], [0], [0], [1], [0, 0, 1, 1], [], []>} : vector<64x4xf32>, vector<4x256xf32>, vector<64x256xf32> -> vector<64x256xf32>
    %c0_4 = arith.constant 0 : index
    %c0_5 = arith.constant 0 : index
    %5 = vector.load %arg4[%c0_4, %c0_5] : memref<64x1xf32, #tpu.memory_space<vmem>>, vector<64x1xf32>
    %6 = vector.broadcast %5 : vector<64x1xf32> to vector<64x256xf32>
    %7 = arith.addf %4, %6 : vector<64x256xf32>
    %cst_6 = arith.constant 0.000000e+00 : f32
    %8 = vector.broadcast %cst_6 : f32 to vector<64x256xf32>
    %9 = arith.maximumf %7, %8 : vector<64x256xf32>
    %c0_7 = arith.constant 0 : index
    %c0_8 = arith.constant 0 : index
    %10 = vector.load %arg5[%c0_7, %c0_8] : memref<1x64xf32, #tpu.memory_space<vmem>>, vector<1x64xf32>
    %cst_9 = arith.constant dense<0.000000e+00> : vector<1x256xf32>
    %11 = tpu.matmul %10, %9, %cst_9 {dimension_numbers = #tpu.dot_dimension_numbers<[1], [0], [0], [1], [0, 0, 1, 1], [], []>} : vector<1x64xf32>, vector<64x256xf32>, vector<1x256xf32> -> vector<1x256xf32>
    %c0_10 = arith.constant 0 : index
    %12 = memref.load %arg6[%c0_10] : memref<1xf32, #tpu.memory_space<smem>>
    %13 = vector.broadcast %12 : f32 to vector<1x256xf32>
    %14 = arith.addf %11, %13 : vector<1x256xf32>
    %15 = arith.negf %14 : vector<1x256xf32>
    %16 = math.exp %15 : vector<1x256xf32>
    %cst_11 = arith.constant 1.000000e+00 : f32
    %17 = vector.broadcast %cst_11 : f32 to vector<1x256xf32>
    %18 = arith.addf %17, %16 : vector<1x256xf32>
    %19 = arith.divf %17, %18 : vector<1x256xf32>
    %20 = arith.truncf %19 : vector<1x256xf32> to vector<1x256xbf16>
    %c0_12 = arith.constant 0 : index
    %c0_13 = arith.constant 0 : index
    %c0_14 = arith.constant 0 : index
    %21 = vector.load %arg8[%c0_12, %c0_13, %c0_14] : memref<1x1x256xbf16, #tpu.memory_space<vmem>>, vector<1x1x256xbf16>
    %22 = vector.shape_cast %21 : vector<1x1x256xbf16> to vector<1x256xbf16>
    %23 = vector.shape_cast %20 : vector<1x256xbf16> to vector<1x1x256xbf16>
    tpu.vector_store %arg8[%c0_12, %c0_13, %c0_14], %23 {strides = array<i32>} : memref<1x1x256xbf16, #tpu.memory_space<vmem>>, vector<1x1x256xbf16>,
    %cst_15 = arith.constant 1.000000e+00 : f32
    %24 = vector.broadcast %cst_15 : f32 to vector<1x256xf32>
    %25 = arith.addf %19, %24 : vector<1x256xf32>
    %26 = vector.broadcast %25 : vector<1x256xf32> to vector<4x256xf32>
    %27 = arith.mulf %26, %2 : vector<4x256xf32>
    %28 = arith.truncf %27 : vector<4x256xf32> to vector<4x256xbf16>
    %c0_16 = arith.constant 0 : index
    %c0_17 = arith.constant 0 : index
    %c0_18 = arith.constant 0 : index
    %29 = vector.load %arg7[%c0_16, %c0_17, %c0_18] : memref<1x4x256xbf16, #tpu.memory_space<vmem>>, vector<1x4x256xbf16>
    %30 = vector.shape_cast %29 : vector<1x4x256xbf16> to vector<4x256xbf16>
    %31 = vector.shape_cast %28 : vector<4x256xbf16> to vector<1x4x256xbf16>
    tpu.vector_store %arg7[%c0_16, %c0_17, %c0_18], %31 {strides = array<i32>} : memref<1x4x256xbf16, #tpu.memory_space<vmem>>, vector<1x4x256xbf16>,
    return
  }
  func.func @transform_0(%arg0: i32, %arg1: i32) -> (i32, i32, i32) {
    %c0_i32 = arith.constant 0 : i32
    %c0_i32_0 = arith.constant 0 : i32
    return %arg0, %c0_i32, %arg1 : i32, i32, i32
  }
  func.func @transform_1(%arg0: i32, %arg1: i32) -> (i32, i32) {
    %c0_i32 = arith.constant 0 : i32
    %c0_i32_0 = arith.constant 0 : i32
    %c0_i32_1 = arith.constant 0 : i32
    return %c0_i32, %c0_i32_0 : i32, i32
  }
  func.func @transform_2(%arg0: i32, %arg1: i32) -> (i32, i32) {
    %c0_i32 = arith.constant 0 : i32
    %c0_i32_0 = arith.constant 0 : i32
    %c0_i32_1 = arith.constant 0 : i32
    return %c0_i32, %c0_i32_0 : i32, i32
  }
  func.func @transform_3(%arg0: i32, %arg1: i32) -> (i32, i32) {
    %c0_i32 = arith.constant 0 : i32
    %c0_i32_0 = arith.constant 0 : i32
    %c0_i32_1 = arith.constant 0 : i32
    return %c0_i32, %c0_i32_0 : i32, i32
  }
  func.func @transform_4(%arg0: i32, %arg1: i32) -> i32 {
    %c0_i32 = arith.constant 0 : i32
    %c0_i32_0 = arith.constant 0 : i32
    return %c0_i32 : i32
  }
  func.func @transform_5(%arg0: i32, %arg1: i32) -> (i32, i32, i32) {
    %c0_i32 = arith.constant 0 : i32
    %c0_i32_0 = arith.constant 0 : i32
    return %arg0, %c0_i32, %arg1 : i32, i32, i32
  }
  func.func @transform_6(%arg0: i32, %arg1: i32) -> (i32, i32, i32) {
    %c0_i32 = arith.constant 0 : i32
    %c0_i32_0 = arith.constant 0 : i32
    return %arg0, %c0_i32, %arg1 : i32, i32, i32
  }
}

</mosaic_0001>

<bundles_post_ra>
// kernel: tpu_custom_call.1
= control target key start
LH: loop header
LB: loop body
LE: loop exit
PB: predicated region body
PF: predicated region fallthrough
CT: control target
= control target key end

     0   :  { %s1218_s0 = inlined_call_operand.vmem [shape: bf16[2,4,256], index: 0, kind: input, shape index: {}]   ;;  %s1219_s1 = inlined_call_operand.vmem [shape: f32[64,4], index: 1, kind: input, shape index: {}]   ;;  %s1220_s2 = inlined_call_operand.vmem [shape: f32[64,1], index: 2, kind: input, shape index: {}]   ;;  %s1221_s3 = inlined_call_operand.vmem [shape: f32[1,64], index: 3, kind: input, shape index: {}]   ;;  %s1222_s4 = inlined_call_operand.<no memory space> [shape: f32[1], index: 4, kind: input, shape index: {}]   ;;  %s1223_s5 = inlined_call_operand.hbm [shape: bf16[2,4,256], index: 5, kind: output, shape index: {0}]   ;;  %s1224_s6 = inlined_call_operand.vmem [shape: bf16[2,1,256], index: 6, kind: output, shape index: {1}]  }
   0x1   :  { %12 = sst [smem:[#allocation2]] %s1222_s4 }
   0x2   :  { %13 = vsyncpa [#allocation4], 0 }
   0x3   :  { %15 = vsyncpa [#allocation4 + $0x1], 0  ;;  %s1027_s23 = smov 0   ;;  %s1029_s24 = smov 0  }
   0x4   :  { %s1031_s25 = smov 0   ;;  %s1033_s26 = smov 0  }
   0x5   :  { %s1035_s27 = smov 0   ;;  %s1037_s28 = smov 0  }
   0x6 LB: > { %s807_s4 = sadd.s32 4294967295, %s983_s28   ;;  %s808_s29 = sadd.s32 4294967294, %s983_s28   ;;  %s983_s28 = sphi %s1037_s28, %s21_s28   ;;  %s979_s27 = sphi %s1035_s27, %s1233_s27   ;;  %s975_s26 = sphi %s1033_s26, %s1232_s26   ;;  %s971_s25 = sphi %s1031_s25, %s1231_s25   ;;  %s967_s24 = sphi %s1029_s24, %s1230_s24   ;;  %s963_s23 = sphi %s1027_s23, %s1229_s23  }
   0x7   : > { %s33_s30 = sadd.s32 1, %s979_s27  ;;  %s154_s7 = sadd.s32 1, %s971_s25 }
   0x8   : > { %p35_p0 = scmp.ge.s32.totalorder %s33_s30, 2  ;;  %p164_p1 = scmp.ne.s32.totalorder %s971_s25, %s967_s24 }
   0x9   : > { %p165_p2 = scmp.eq.s32.totalorder %s807_s4, 1  ;;  %p170_p3 = scmp.ne.s32.totalorder %s967_s24, %s963_s23 }
   0xa   : > { %s1235_s30 = smov (%p35_p0, %s33_s30), 0  ;;  %p171_p5 = scmp.eq.s32.totalorder %s808_s29, 1 }
   0xb   : > { %p1067_p4 = por %p165_p2, %p164_p1  ;;  %s149_s9 = ssub.s32 %s979_s27, %s1235_s30 }
   0xc   : > { %p811_p6 = scmp.ge.s32.totalorder %s983_s28, 1  ;;  %p152_p7 = scmp.eq.s32.totalorder %s149_s9, 0 }
   0xd   : > { %p1074_p8 = por %p171_p5, %p170_p3  ;;  %p242_p9 = scmp.lt.s32.totalorder %s983_s28, 3 }
   0xe   : > { %s1080_s11 = scalar_select %p152_p7, %s971_s25, %s154_s7  }
   0xf   : > { %p243_p10 = pnand %p811_p6, %p242_p9 }
  0x10   : > { %p285_p11 = scmp.lt.s32.totalorder (!%p243_p10), %s975_s26, 1  ;;  %s524_s4 = sld [smem:[#allocation2]] (!%p243_p10) }
  0x11   : > { %246 = sbr.rel (%p243_p10) target bundleno = 526 (0x20e), region = 40  ;;  %s271_s29 = sand.u32 (!%p243_p10), 1, %s967_s24  }
  0x12   : > { %s812_s9 = sshll.u32 (!%p243_p10), %s271_s29, 2  ;;  %s671_s21 = scalar_lea.sflag (!%p243_p10), [#allocation4], %s271_s29 }
  0x13   : > { %s273_s16 = scalar_lea.vmem (!%p243_p10), [#allocation3], %s812_s9  ;;  %s988_s22 = smov (!%p243_p10), [#allocation3]  }
  0x16   : > { %v985_v0 = vmov 0.0   ;;  %s1084_s12 = scalar_select %p285_p11, %s975_s26, 1  ;;  %v986_v1 = vmov 0   ;;  %v319_v2 = vld [vmem:[%s1220_s2 + $0x28] sm:$0xff]  ;;  %v321_v3 = vld [vmem:[%s1220_s2 + $0x38] sm:$0xff]  ;;  %v318_v4 = vld [vmem:[%s1220_s2 + $0x20] sm:$0xff] }
  0x17   : > { %458 = vmatprep.mubr.f32.mxu0 %v985_v0  ;;  %594 = vmatprep.mubr.f32.mxu1 %v985_v0  ;;  %v320_v5 = vld [vmem:[%s1220_s2 + $0x30] sm:$0xff]  ;;  %vm389_vm0 = vcmask 1043456   ;;  %v306_v10 = vld [vmem:[%s1219_s1] sm:$0xff]  ;;  %vm364_vm1 = vcmask 31744   ;;  %v317_v11 = vld [vmem:[%s1220_s2 + $0x18] sm:$0xff]  ;;  %vm526_vm2 = vcmask 523264  }
  0x18   : > { %898 = vset.pattern.permute.xlu1 %v986_v1  ;;  %897 = vset.pattern.permute.xlu0 %v986_v1  ;;  %s837_s17 = sshll.u32 %s1084_s12, 2  ;;  %v316_v9 = vld [vmem:[%s1220_s2 + $0x10] sm:$0xff]  ;;  %v314_v12 = vld [vmem:[%s1220_s2] sm:$0xff]  ;;  %v307_v13 = vld [vmem:[%s1219_s1 + $0x8] sm:$0xff]  ;;  %vm633_vm3 = vcmask 1040384   ;;  %s815_s7 = sshll.u32 %s1084_s12, 1 }
  0x19   : > { %349 = vperm.xlu1 %898, %v319_v2   ;;  %359 = vperm.xlu0 %897, %v321_v3   ;;  %s292_s20 = scalar_lea.vmem %s1218_s0, %s837_s17  ;;  %v315_v14 = vld [vmem:[%s1220_s2 + $0x8] sm:$0xff]  ;;  %v308_v15 = vld [vmem:[%s1219_s1 + $0x10] sm:$0xff]  ;;  %v309_v16 = vld [vmem:[%s1219_s1 + $0x18] sm:$0xff]  ;;  %vm634_vm4 = vsmask.f32 256  ;;  %vm636_vm5 = vcmask 1041409   ;;  %s302_s15 = scalar_lea.vmem %s1224_s6, %s815_s7 }
  0x1a   : > { %v304_v6 = vld [vmem:[%s292_s20] sm:$0xf]  ;;  %v311_v18 = vld [vmem:[%s1219_s1 + $0x28] sm:$0xff]  ;;  %v312_v19 = vld [vmem:[%s1219_s1 + $0x30] sm:$0xff]  ;;  %vm637_vm6 = vsmask.f32 1280 }
  0x1b   : > { %v1102_v7 = vunpack.c.l.bf16 %v304_v6  ;;  %v310_v17 = vld [vmem:[%s1219_s1 + $0x20] sm:$0xff]  ;;  %v313_v20 = vld [vmem:[%s1219_s1 + $0x38] sm:$0xff]  ;;  %vm1161_vm7 = vmand %vm633_vm3, %vm634_vm4  ;;  %s838_s12 = sshll.u32 %s975_s26, 6  ;;  %s695_s17 = sshll.u32 %s273_s16, 4  ;;  %s696_s17 = int_to_ptr.vmem [resolvable:$true] %s695_s17 }
  0x1c   : > { %vm638_vm8 = vmand %vm636_vm5, %vm637_vm6  ;;  %s1176_s20 = scalar_lea.hbm %s1223_s5, %s838_s12  ;;  %s907_s26 = scalar_lea.vmem %s696_s17, 64 }
  0x1d   : > { %344 = vperm.xlu1 %898, %v318_v4   ;;  %354 = vperm.xlu0 %897, %v320_v5   ;;  %v1106_v8 = vcombine.high %v1102_v7, %v1102_v7  ;;  %vm639_vm9 = vmor %vm638_vm8, %vm1161_vm7  ;;  %p908_p12 = scmp.ne.s32.totalorder %s696_s17, %s907_s26 }
  0x1f   : > { %816 = vmatprep.subr.msk.mxu0 %vm389_vm0, %v1106_v8  ;;  %p909_p13 = pnand %p908_p12, %p1067_p4 }
  0x20   : > { %817 = vmatpush1.msk.msra.mxu0 %vm389_vm0, %v1102_v7 }
  0x21   : > { %334 = vperm.xlu1 %898, %v316_v9   ;;  %818 = vmatmul.mubr.msk.f32.vlgmr.msra.gmra.mxu0 %vm364_vm1, %v306_v10  ;;  %p910_p0 = pneg %p909_p13 }
  0x22   : > { %339 = vperm.xlu0 %897, %v317_v11   ;;  %464 = vmatprep.mubr.f32.mxu0 %v985_v0 }
  0x25   : > { %324 = vperm.xlu1 %898, %v314_v12   ;;  %819 = vmatmul.mubr.msk.f32.gmra.mxu0 %vm364_vm1, %v307_v13 }
  0x26   : > { %329 = vperm.xlu0 %897, %v315_v14   ;;  %470 = vmatprep.mubr.f32.mxu0 %v985_v0 }
  0x29   : > { %820 = vmatmul.mubr.msk.f32.gmra.mxu0 %vm364_vm1, %v308_v15  ;;  %v523_v15 = vld [vmem:[%s1221_s3] sm:$0x1] }
  0x2a   : > { %476 = vmatprep.mubr.f32.mxu0 %v985_v0 }
  0x2d   : > { %821 = vmatmul.mubr.msk.f32.gmra.mxu0 %vm364_vm1, %v309_v16  ;;  %v525_v16 = vstv %s524_s4  ;;  %s911_s4 = sshll.u32 %s988_s22, 4  ;;  %s912_s4 = int_to_ptr.vmem [resolvable:$false] %s911_s4 }
  0x2e   : > { %482 = vmatprep.mubr.f32.mxu0 %v985_v0  ;;  %s913_s7 = scalar_lea.vmem %s912_s4, 128  ;;  %p914_p1 = scmp.lt.s32.totalorder %s696_s17, %s912_s4 }
  0x2f   : > { %p915_p2 = scmp.lt.s32.totalorder %s913_s7, %s907_s26 }
  0x31   : > { %822 = vmatmul.mubr.msk.f32.gmra.mxu0 %vm364_vm1, %v310_v17  ;;  %p916_p3 = por %p915_p2, %p914_p1 }
  0x32   : > { %488 = vmatprep.mubr.f32.mxu0 %v985_v0 }
  0x33   : > { %p917_p5 = pnand %p916_p3, %p910_p0 }
  0x35   : > { %823 = vmatmul.mubr.msk.f32.gmra.mxu0 %vm364_vm1, %v311_v18 }
  0x36   : > { %494 = vmatprep.mubr.f32.mxu0 %v985_v0 }
  0x39   : > { %824 = vmatmul.mubr.msk.f32.gmra.mxu0 %vm364_vm1, %v312_v19 }
  0x3a   : > { %500 = vmatprep.mubr.f32.mxu0 %v985_v0 }
  0x3d   : > { %825 = vmatmul.mubr.msk.f32.gmra.mxu0 %vm364_vm1, %v313_v20 }
  0x94   : > { %v360_v32 = vpop.permute.xlu0 %359  ;;  %v350_v34 = vpop.permute.xlu1 %349 }
  0x98   : > { %v355_v37 = vpop.permute.xlu0 %354  ;;  %v345_v39 = vpop.permute.xlu1 %344 }
  0x9c   : > { %v335_v50 = vpop.permute.xlu1 %334 }
  0x9d   : > { %v340_v45 = vpop.permute.xlu0 %339 }
  0xa0   : > { %v325_v0 = vpop.permute.xlu1 %324 }
  0xa1   : > { %v330_v59 = vpop.permute.xlu0 %329 }
  0xe1   : > { %v460_v21 = vpop.f32.mrf.mxu0 }
  0xe2   : > { %v461_v9 = vadd.f32 %v460_v21, %v325_v0 }
  0xe3   : > { %v462_v22 = vpop.f32.mrf.mxu0 }
  0xe4   : > { %v463_v5 = vadd.f32 %v462_v22, %v325_v0  ;;  %v507_v14 = vmax.f32 %v461_v9, 0.0 }
  0xe5   : > { %v466_v23 = vpop.f32.mrf.mxu0 }
  0xe6   : > { %v467_v3 = vadd.f32 %v466_v23, %v330_v59  ;;  %v508_v13 = vmax.f32 %v463_v5, 0.0 }
  0xe7   : > { %v468_v24 = vpop.f32.mrf.mxu0 }
  0xe8   : > { %v469_v1 = vadd.f32 %v468_v24, %v330_v59  ;;  %v509_v12 = vmax.f32 %v467_v3, 0.0 }
  0xe9   : > { %v472_v25 = vpop.f32.mrf.mxu0 }
  0xea   : > { %v473_v62 = vadd.f32 %v472_v25, %v335_v50  ;;  %v510_v11 = vmax.f32 %v469_v1, 0.0 }
  0xeb   : > { %v474_v26 = vpop.f32.mrf.mxu0 }
  0xec   : > { %v475_v60 = vadd.f32 %v474_v26, %v335_v50  ;;  %v511_v10 = vmax.f32 %v473_v62, 0.0 }
  0xed   : > { %v478_v27 = vpop.f32.mrf.mxu0 }
  0xee   : > { %v479_v57 = vadd.f32 %v478_v27, %v340_v45  ;;  %v512_v6 = vmax.f32 %v475_v60, 0.0  ;;  %v621_v27 = vlaneseq }
  0xef   : > { %v480_v28 = vpop.f32.mrf.mxu0 }
  0xf0   : > { %v481_v55 = vadd.f32 %v480_v28, %v340_v45  ;;  %v513_v4 = vmax.f32 %v479_v57, 0.0  ;;  %v987_v28 = vmov 1966171168  }
  0xf1   : > { %v484_v29 = vpop.f32.mrf.mxu0 }
  0xf2   : > { %v485_v53 = vadd.f32 %v484_v29, %v345_v39  ;;  %v514_v2 = vmax.f32 %v481_v55, 0.0  ;;  %v619_v29 = vunpack.c.l.s4 %v987_v28 }
  0xf3   : > { %v486_v30 = vpop.f32.mrf.mxu0 }
  0xf4   : > { %v487_v51 = vadd.f32 %v486_v30, %v345_v39  ;;  %v515_v63 = vmax.f32 %v485_v53, 0.0  ;;  %v622_v30 = vshrl.u32 %v621_v27, 7 }
  0xf5   : > { %v490_v31 = vpop.f32.mrf.mxu0 }
  0xf6   : > { %v491_v48 = vadd.f32 %v490_v31, %v350_v34  ;;  %v516_v61 = vmax.f32 %v487_v51, 0.0  ;;  %v620_v31 = vunpack.c.0.s8 %v619_v29 }
  0xf7   : > { %v492_v33 = vpop.f32.mrf.mxu0 }
  0xf8   : > { %v493_v46 = vadd.f32 %v492_v33, %v350_v34  ;;  %v517_v58 = vmax.f32 %v491_v48, 0.0  ;;  %v623_v34 = vsub.s32 %v620_v31, %v622_v30 }
  0xf9   : > { %v496_v35 = vpop.f32.mrf.mxu0 }
  0xfa   : > { %v497_v44 = vadd.f32 %v496_v35, %v355_v37  ;;  %v518_v56 = vmax.f32 %v493_v46, 0.0 }
  0xfb   : > { %v498_v36 = vpop.f32.mrf.mxu0 }
  0xfc   : > { %v499_v42 = vadd.f32 %v498_v36, %v355_v37  ;;  %v519_v54 = vmax.f32 %v497_v44, 0.0 }
  0xfd   : > { %v502_v38 = vpop.f32.mrf.mxu0 }
  0xfe   : > { %v503_v40 = vadd.f32 %v502_v38, %v360_v32  ;;  %v520_v52 = vmax.f32 %v499_v42, 0.0 }
  0xff   : > { %v504_v41 = vpop.f32.mrf.mxu0 }
 0x100   : > { %v505_v43 = vadd.f32 %v504_v41, %v360_v32  ;;  %v521_v49 = vmax.f32 %v503_v40, 0.0  ;;  %v647_v32 = vsub.s32 0, %v622_v30 }
 0x102   : > { %v522_v47 = vmax.f32 %v505_v43, 0.0  ;;  %v640_v43 = vld [vmem:[%s302_s15] sm:$0x3] }
 0x104   : > { %546 = vmatprep.subr.mxu1 %v522_v47 }
 0x105   : > { %547 = vmatpush1.msra.mxu1 %v521_v49 }
 0x106   : > { %548 = vmatprep.subr.mxu1 %v520_v52 }
 0x107   : > { %549 = vmatpush1.msra.mxu1 %v519_v54 }
 0x108   : > { %550 = vmatprep.subr.mxu1 %v518_v56 }
 0x109   : > { %551 = vmatpush1.msra.mxu1 %v517_v58 }
 0x10a   : > { %552 = vmatprep.subr.mxu1 %v516_v61 }
 0x10b   : > { %553 = vmatpush1.msra.mxu1 %v515_v63 }
 0x10c   : > { %554 = vmatprep.subr.mxu1 %v514_v2 }
 0x10d   : > { %555 = vmatpush1.msra.mxu1 %v513_v4 }
 0x10e   : > { %556 = vmatprep.subr.mxu1 %v512_v6 }
 0x10f   : > { %557 = vmatpush1.msra.mxu1 %v511_v10 }
 0x110   : > { %558 = vmatprep.subr.mxu1 %v510_v11 }
 0x111   : > { %559 = vmatpush1.msra.mxu1 %v509_v12 }
 0x112   : > { %560 = vmatprep.subr.mxu1 %v508_v13 }
 0x113   : > { %561 = vmatpush1.msra.mxu1 %v507_v14 }
 0x114   : > { %826 = vmatmul.mubr.msk.f32.vlgmr.msra.gmra.mxu1 %vm526_vm2, %v523_v15 }
 0x1d4   : > { %v596_v17 = vpop.f32.mrf.mxu1 }
 0x1d5   : > { %v597_v18 = vadd.f32 %v596_v17, %v525_v16 }
 0x1d6   : > { %v598_v19 = vpop.f32.mrf.mxu1 }
 0x1d7   : > { %v827_v20 = vmul.f32 -1.442695, %v597_v18  ;;  %v599_v21 = vadd.f32 %v598_v19, %v525_v16 }
 0x1d9   : > { %899 = vpow2.f32 %v827_v20  ;;  %v828_v22 = vmul.f32 -1.442695, %v599_v21 }
 0x1db   : > { %901 = vpow2.f32 %v828_v22 }
 0x1e6   : > { %v900_v23 = vpop.eup %899 }
 0x1e7   : > { %v607_v24 = vadd.f32 1.0, %v900_v23 }
 0x1e8   : > { %v902_v25 = vpop.eup %901 }
 0x1e9   : > { %903 = vrcp.f32 %v607_v24  ;;  %v608_v26 = vadd.f32 1.0, %v902_v25 }
 0x1eb   : > { %905 = vrcp.f32 %v608_v26 }
 0x1f6   : > { %v904_v33 = vpop.eup %903 }
 0x1f7   : > { %v643_v35 = vadd.f32 1.0, %v904_v33 }
 0x1f8   : > { %v906_v36 = vpop.eup %905 }
 0x1f9   : > { %v829_v38 = vpack.c.bf16 %v906_v36, %v904_v33  ;;  %v644_v39 = vadd.f32 1.0, %v906_v36  ;;  %v648_v40 = vrot.slane %v643_v35, %v647_v32 }
 0x1fb   : > { %v624_v41 = vrot.slane %v829_v38, %v623_v34  ;;  %v652_v42 = vrot.slane %v644_v39, %v647_v32  ;;  %v654_v45 = vmul.f32 %v648_v40, %v1102_v7 }
 0x1fd   : > { %v631_v44 = vrot.slane %v624_v41, %v623_v34  ;;  %v655_v46 = vmul.f32 %v652_v42, %v1106_v8 }
 0x1ff   : > { %v641_v47 = vsel %vm639_vm9, %v631_v44, %v640_v43  ;;  %v830_v48 = vpack.c.bf16 %v655_v46, %v654_v45 }
 0x200   : > { %642 = vst [vmem:[%s302_s15] sm:$0x3] %v641_v47 }
 0x201   : > { %831 = vst.sshfl [vmem:[%s273_s16] sm:$0x33 pattern:$0x76325410] %v830_v48 }
 0x202   : > { %920 = shalt.err (!%p917_p5)
}
 0x203   : > { %s921_s9 = scalar_lea.hbm %s1176_s20, 64  ;;  %s925_s14 = scalar_lea.hbm %s1223_s5, 128 }
 0x204   : > { %p922_p6 = scmp.ne.s32.totalorder %s1176_s20, %s921_s9  ;;  %p926_p10 = scmp.lt.s32.totalorder %s1176_s20, %s1223_s5 }
 0x205   : > { %p927_p11 = scmp.lt.s32.totalorder %s925_s14, %s921_s9 }
 0x206   : > { %p923_p7 = pnand %p922_p6, %p1067_p4 }
 0x207   : > { %p928_p12 = por %p927_p11, %p926_p10 }
 0x208   : > { %p924_p9 = pneg %p923_p7 }
 0x20a   : > { %p929_p13 = pnand %p928_p12, %p924_p9 }
 0x20c   : > { %932 = shalt.err (!%p929_p13)
}
 0x20d   : > { %839 = dma.vmem_to_hbm [thread:$0]  (%p1067_p4), %s696_s17, 64, %s1176_s20, %s671_s21  }
 0x20e PF: > { %p845_p0 = scmp.ge.s32.totalorder %s983_s28, 2  ;;  %s711_s16 = sand.u32 1, %s963_s23  }
 0x20f   : > { %s712_s18 = scalar_lea.sflag [#allocation4], %s711_s16 }
 0x210   : > { %p842_p1 = pnand %p845_p0, %p1074_p8 }
 0x212   : > { %p843_p2 = pneg %p842_p1 }
 0x214   : > { %958 = dma.done.wait (%p843_p2), %s712_s18, 64  }
 0x215   : > { %960 = vsyncadd (%p843_p2), %s712_s18, 4294967232  ;;  %s21_s28 = sadd.s32 1, %s983_s28   ;;  %s1229_s23 = smov %s967_s24 }
 0x216   : > { %p18_p3 = scmp.ge.s32.totalorder %s21_s28, 4   ;;  %s1230_s24 = smov %s971_s25 }
 0x217   : > { %s1231_s25 = smov %s1080_s11  ;;  %s1232_s26 = smov %s979_s27 }
 0x218   : > { %s1233_s27 = smov %s1235_s30  ;;  %20 = sbr.rel (!%p18_p3) target bundleno = 6 (0x6), region = 87 }
 0x21d   :  { %728 = vsyncpa [#allocation4], 1 }
 0x21e   :  { %730 = vsyncpa [#allocation4 + $0x1], 1 }

</bundles_post_ra>
